<compile_context>
chip_gen: v6e
topology: v6e:2x2x1
jax: 0.10.0
libtpu: 0.0.40
codegen_flags: <defaults>
</compile_context>

<pallas_src>
import jax
import jax.numpy as jnp
from jax.experimental import pallas as pl
from jax.experimental.pallas import tpu as pltpu


def _round_up(x, m):
    return (x + m - 1) // m * m


def _vmem_capacity_bytes():
    """Per-core VMEM capacity (128 MiB on v5e/v6e, 64 MiB on v7x)."""
    try:
        return int(pltpu.get_tpu_info().vmem_capacity_bytes)
    except Exception:
        return 64 * 1024 * 1024  # conservative (v7x per-TC)


def _choose_tm(Bp):
    """Largest batch tile <= 512 dividing Bp; keep >=2 M blocks when the whole
    batch would otherwise be a single big tile (v7x has 2 TensorCores)."""
    tm = next((t for t in (512, 256, 128, 64, 32, 16, 8) if Bp % t == 0), 8)
    if Bp // tm == 1 and tm >= 128:
        tm //= 2
    return tm


def _plan(Bp, Fp, x_bytes, out_bytes, budget):
    """Return (mode, tm, tn, tk).  mode == "resident": collapsed K, W^T held in
    VMEM.  mode == "tiled": (M, N, K) grid with an f32 accumulator."""
    tm = _choose_tm(Bp)

    def resident_need(t):
        # Conservative: budget 2 buffers per operand (Pallas double-buffers by
        # default even for the constant-index resident weight).
        return (2 * Fp * Fp * 2            # W^T (bf16)
                + 2 * t * Fp * x_bytes     # x tile
                + 2 * t * Fp * out_bytes   # output tile
                + 2 * Fp * 4)              # bias

    t = tm
    while True:
        if resident_need(t) <= budget:
            return "resident", t, Fp, Fp
        nt = t // 2
        if nt < 8 or Bp % nt or nt % 8:
            break
        t = nt

    # Fallback: tiled K reduction (only hit for very large feature dims).
    tm2 = min(tm, 256) if Bp % 256 == 0 or tm <= 256 else tm
    if Bp % tm2:
        tm2 = tm
    tn = 512 if Fp % 512 == 0 else (256 if Fp % 256 == 0 else 128)
    for tk in (2048, 1024, 512, 256, 128):
        if Fp % tk:
            continue
        need = (2 * tm2 * tk * 2 + 2 * tk * tn * 2 + tm2 * tn * 4
                + 2 * tm2 * tn * out_bytes + 2 * tn * 4)
        if need <= budget:
            return "tiled", tm2, tn, tk
    return "tiled", tm2, 128, 128


def prepare_params(weight, bias):
    """One-time parameter layout: transpose to (F_in, F_out), pad to a 128
    multiple, cast weight to bf16 for the MXU feed.  Runs at setup, NOT per
    forward call."""
    F = weight.shape[0]
    Fp = _round_up(F, 128)
    wt = jnp.asarray(weight).T                                   # (F_in, F_out)
    wt = jnp.pad(wt, ((0, Fp - F), (0, Fp - F))).astype(jnp.bfloat16)
    b2 = jnp.pad(jnp.asarray(bias), (0, Fp - F)).reshape(1, Fp).astype(jnp.float32)
    return wt, b2


def _fused_kernel(x_ref, wt_ref, b_ref, o_ref):
    # Resident-W path: whole K contraction in one MXU pass per batch tile.
    # x_ref: (tm, Fp) [f32 or bf16]   wt_ref: (Fp, Fp) bf16 (VMEM-resident)
    # b_ref: (1, Fp) f32              o_ref: (tm, Fp)
    x = x_ref[...].astype(jnp.bfloat16)          # in-kernel cast (x read only once)
    y = jnp.dot(x, wt_ref[...], preferred_element_type=jnp.float32)
    y = y + b_ref[...]                           # f32 bias add (broadcast rows)
    o_ref[...] = jnp.maximum(y, 0.0).astype(o_ref.dtype)   # ReLU in f32, then cast
    # Dropout(p=0.0) == identity: elided.


def _tiled_kernel(x_ref, wt_ref, b_ref, o_ref, acc_ref):
    # Fallback path: (M, N, K) grid, f32 VMEM accumulator over K.
    k = pl.program_id(2)

    @pl.when(k == 0)
    def _():
        acc_ref[...] = jnp.zeros_like(acc_ref)

    acc_ref[...] += jnp.dot(x_ref[...], wt_ref[...],
                            preferred_element_type=jnp.float32)

    @pl.when(k == pl.num_programs(2) - 1)
    def _():
        y = acc_ref[...] + b_ref[...]
        o_ref[...] = jnp.maximum(y, 0.0).astype(o_ref.dtype)


def linear_block(x, wt, b2, out_dtype=None):
    """y = relu(x @ W.T + b).  `wt`, `b2` come from prepare_params
    (pre-transposed, padded, bf16 weight).  x: (B, F) with F <= wt.shape[0].
    out_dtype=jnp.bfloat16 halves writeback traffic (changes dtype contract)."""
    B, F = x.shape
    Fp = wt.shape[0]
    assert wt.shape == (Fp, Fp) and b2.shape == (1, Fp) and Fp % 128 == 0 and F <= Fp
    out_dtype = jnp.dtype(out_dtype) if out_dtype is not None else x.dtype

    # Ragged-shape handling (no-ops -- off the hot path -- when B % 8 == 0 and
    # F % 128 == 0, which inter-layer shapes should satisfy).
    if F != Fp:
        x = jnp.pad(x, ((0, 0), (0, Fp - F)))
    Bp = _round_up(B, 8)
    if Bp != B:
        x = jnp.pad(x, ((0, Bp - B), (0, 0)))

    vmem_cap = _vmem_capacity_bytes()
    vmem_limit = max(32 << 20, min(int(vmem_cap * 0.8), 96 << 20))
    budget = vmem_limit - (2 << 20)            # headroom for internal scratch

    mode, tm, tn, tk = _plan(Bp, Fp, x.dtype.itemsize, out_dtype.itemsize, budget)

    if mode == "resident":
        cost = pl.CostEstimate(
            flops=2 * Bp * Fp * Fp,
            transcendentals=0,
            bytes_accessed=(Bp * Fp * x.dtype.itemsize + Fp * Fp * 2 + Fp * 4
                            + Bp * Fp * out_dtype.itemsize),
        )
        out = pl.pallas_call(
            _fused_kernel,
            out_shape=jax.ShapeDtypeStruct((Bp, Fp), out_dtype),
            grid_spec=pltpu.PrefetchScalarGridSpec(
                num_scalar_prefetch=0,
                grid=(Bp // tm,),
                in_specs=[
                    # x panel: streamed over batch tiles (read exactly once).
                    pl.BlockSpec((tm, Fp), lambda i: (i, 0)),
                    # W^T: constant block index -> DMA'd once, stays VMEM-resident.
                    pl.BlockSpec((Fp, Fp), lambda i: (0, 0)),
                    # bias: constant block index -> DMA'd once.
                    pl.BlockSpec((1, Fp), lambda i: (0, 0)),
                ],
                out_specs=pl.BlockSpec((tm, Fp), lambda i: (i, 0)),
            ),
            compiler_params=pltpu.CompilerParams(
                dimension_semantics=("parallel",),
                vmem_limit_bytes=vmem_limit,
            ),
            cost_estimate=cost,
        )(x, wt, b2)
    else:
        # Very large Fp: W^T cannot stay resident; stream it with a K grid.
        xb = x.astype(jnp.bfloat16)   # x is re-read Fp//tn times below, so one
        #                               wrapper-side cast to halve that traffic.
        grid = (Bp // tm, Fp // tn, Fp // tk)
        cost = pl.CostEstimate(
            flops=2 * Bp * Fp * Fp,
            transcendentals=0,
            bytes_accessed=((Fp // tn) * Bp * Fp * 2 + Fp * Fp * 2 + Fp * 4
                            + Bp * Fp * out_dtype.itemsize),
        )
        out = pl.pallas_call(
            _tiled_kernel,
            out_shape=jax.ShapeDtypeStruct((Bp, Fp), out_dtype),
            grid_spec=pltpu.PrefetchScalarGridSpec(
                num_scalar_prefetch=0,
                grid=grid,
                in_specs=[
                    pl.BlockSpec((tm, tk), lambda i, j, k: (i, k)),   # x tile
                    pl.BlockSpec((tk, tn), lambda i, j, k: (k, j)),   # W^T tile
                    pl.BlockSpec((1, tn), lambda i, j, k: (0, j)),    # bias tile
                ],
                out_specs=pl.BlockSpec((tm, tn), lambda i, j, k: (i, j)),
                scratch_shapes=[pltpu.VMEM((tm, tn), jnp.float32)],
            ),
            compiler_params=pltpu.CompilerParams(
                dimension_semantics=("parallel", "parallel", "arbitrary"),
                vmem_limit_bytes=vmem_limit,
            ),
            cost_estimate=cost,
        )(xb, wt, b2)

    if Bp != B or Fp != F:
        out = out[:B, :F]
    return out


if __name__ == "__main__":
    # Small, aligned demo sizes: batch a multiple of 8, feature dim a multiple
    # of 128, so the wrapper pad/slice paths are skipped and the resident-W
    # kernel runs a (2,)-step grid (>= 2 batch tiles -> exercises the
    # constant-index weight reuse and keeps both v7x TCs busy).
    fcn = 256
    batch = 128

    key = jax.random.PRNGKey(0)
    kx, kw, kb = jax.random.split(key, 3)

    # nn.Linear-style init: U(-1/sqrt(fcn), 1/sqrt(fcn))
    bound = 1.0 / (fcn ** 0.5)
    weight = jax.random.uniform(kw, (fcn, fcn), jnp.float32, -bound, bound)
    bias = jax.random.uniform(kb, (fcn,), jnp.float32, -bound, bound)
    x = jax.random.normal(kx, (batch, fcn), jnp.float32)

    # One-time parameter preparation (transpose + pad + bf16), off the call path.
    wt, b2 = prepare_params(weight, bias)

    out = linear_block(x, wt, b2)
    jax.block_until_ready(out)
    assert out.shape == (batch, fcn)
    assert out.dtype == x.dtype

    # Reference matching the kernel's numerics: bf16 MXU inputs, f32 accumulation.
    ref_bf16 = jnp.maximum(
        jnp.dot(x.astype(jnp.bfloat16), weight.T.astype(jnp.bfloat16),
                preferred_element_type=jnp.float32) + bias,
        0.0,
    )
    assert jnp.allclose(out, ref_bf16, atol=1e-4, rtol=1e-4)

    # Loose check against the pure-f32 nn.Linear + ReLU semantics.
    ref_f32 = jnp.maximum(x @ weight.T + bias, 0.0)
    assert jnp.allclose(out, ref_f32, atol=5e-2, rtol=5e-2)

    print("KERNEL_OK")
</pallas_src>

<mosaic_0001>
module attributes {stable_mosaic.version = 11 : i64} {
  func.func @_fused_kernel(%arg0: i32, %arg1: memref<64x256xf32, #tpu.memory_space<vmem>>, %arg2: memref<256x256xbf16, #tpu.memory_space<vmem>>, %arg3: memref<1x256xf32, #tpu.memory_space<vmem>>, %arg4: memref<64x256xf32, #tpu.memory_space<vmem>>) attributes {dimension_semantics = [#tpu.dimension_semantics<parallel>], iteration_bounds = array<i64: 2>, scalar_prefetch = 0 : i64, scratch_operands = 0 : i64, tpu.core_type = #tpu.core_type<tc>, window_params = [{transform_indices = @transform_0, window_bounds = array<i64: 64, 256>}, {pipeline_mode = #tpu.pipeline_mode<synchronous>, transform_indices = @transform_1, window_bounds = array<i64: 256, 256>}, {pipeline_mode = #tpu.pipeline_mode<synchronous>, transform_indices = @transform_2, window_bounds = array<i64: 1, 256>}, {transform_indices = @transform_3, window_bounds = array<i64: 64, 256>}]} {
    %c0 = arith.constant 0 : index
    %c0_0 = arith.constant 0 : index
    %0 = vector.load %arg1[%c0, %c0_0] : memref<64x256xf32, #tpu.memory_space<vmem>>, vector<64x256xf32>
    %1 = arith.truncf %0 : vector<64x256xf32> to vector<64x256xbf16>
    %c0_1 = arith.constant 0 : index
    %c0_2 = arith.constant 0 : index
    %2 = vector.load %arg2[%c0_1, %c0_2] : memref<256x256xbf16, #tpu.memory_space<vmem>>, vector<256x256xbf16>
    %cst = arith.constant dense<0.000000e+00> : vector<64x256xf32>
    %3 = tpu.matmul %1, %2, %cst {dimension_numbers = #tpu.dot_dimension_numbers<[1], [0], [0], [1], [0, 0, 1, 1], [], []>} : vector<64x256xbf16>, vector<256x256xbf16>, vector<64x256xf32> -> vector<64x256xf32>
    %c0_3 = arith.constant 0 : index
    %c0_4 = arith.constant 0 : index
    %4 = vector.load %arg3[%c0_3, %c0_4] : memref<1x256xf32, #tpu.memory_space<vmem>>, vector<1x256xf32>
    %5 = vector.broadcast %4 : vector<1x256xf32> to vector<64x256xf32>
    %6 = arith.addf %3, %5 : vector<64x256xf32>
    %cst_5 = arith.constant 0.000000e+00 : f32
    %7 = vector.broadcast %cst_5 : f32 to vector<64x256xf32>
    %8 = arith.maximumf %6, %7 : vector<64x256xf32>
    %c0_6 = arith.constant 0 : index
    %c0_7 = arith.constant 0 : index
    %9 = vector.load %arg4[%c0_6, %c0_7] : memref<64x256xf32, #tpu.memory_space<vmem>>, vector<64x256xf32>
    tpu.vector_store %arg4[%c0_6, %c0_7], %8 {strides = array<i32>} : memref<64x256xf32, #tpu.memory_space<vmem>>, vector<64x256xf32>,
    return
  }
  func.func @transform_0(%arg0: i32) -> (i32, i32) {
    %c0_i32 = arith.constant 0 : i32
    %c0_i32_0 = arith.constant 0 : i32
    return %arg0, %c0_i32 : i32, i32
  }
  func.func @transform_1(%arg0: i32) -> (i32, i32) {
    %c0_i32 = arith.constant 0 : i32
    %c0_i32_0 = arith.constant 0 : i32
    %c0_i32_1 = arith.constant 0 : i32
    return %c0_i32, %c0_i32_0 : i32, i32
  }
  func.func @transform_2(%arg0: i32) -> (i32, i32) {
    %c0_i32 = arith.constant 0 : i32
    %c0_i32_0 = arith.constant 0 : i32
    %c0_i32_1 = arith.constant 0 : i32
    return %c0_i32, %c0_i32_0 : i32, i32
  }
  func.func @transform_3(%arg0: i32) -> (i32, i32) {
    %c0_i32 = arith.constant 0 : i32
    %c0_i32_0 = arith.constant 0 : i32
    return %arg0, %c0_i32 : i32, i32
  }
}

</mosaic_0001>

<bundles_post_ra>
// kernel: tpu_custom_call.1
= control target key start
LH: loop header
LB: loop body
LE: loop exit
PB: predicated region body
PF: predicated region fallthrough
CT: control target
= control target key end

     0   :  { %8 = vsyncpa [#allocation3], 0  ;;  %s1209_s0 = inlined_call_operand.hbm [shape: f32[128,256], index: 0, kind: input, shape index: {}]   ;;  %s1210_s1 = inlined_call_operand.hbm [shape: bf16[256,256], index: 1, kind: input, shape index: {}]   ;;  %s1211_s2 = inlined_call_operand.vmem [shape: f32[1,256], index: 2, kind: input, shape index: {}]   ;;  %s1212_s3 = inlined_call_operand.hbm [shape: f32[128,256], index: 3, kind: output, shape index: {}]  }
   0x1   :  { %10 = vsyncpa [#allocation3 + $0x1], 0 }
   0x2   :  { %11 = vsyncpa [#allocation6], 0 }
   0x3   :  { %12 = vsyncpa [#allocation4], 0 }
   0x4   :  { %14 = vsyncpa [#allocation4 + $0x1], 0  ;;  %s988_s12 = smov 0   ;;  %s990_s13 = smov 0  }
   0x5   :  { %s992_s14 = smov 0   ;;  %s994_s15 = smov 0  }
   0x6 LB: > { %s1009_s16 = sadd.s32 4294967295, %s957_s15   ;;  %s638_s17 = sadd.s32 4294967294, %s957_s15   ;;  %s957_s15 = sphi %s994_s15, %s1234_s15   ;;  %s953_s14 = sphi %s992_s14, %s1233_s14   ;;  %s949_s13 = sphi %s990_s13, %s1232_s13   ;;  %s945_s12 = sphi %s988_s12, %s1231_s12  }
   0x7   : > { %p40_p0 = scmp.ne.s32.totalorder %s949_s13, %s945_s12  ;;  %p1213_p1 = scmp.eq.s32.totalorder %s1009_s16, 0 }
   0x8   : > { %p112_p3 = scmp.eq.s32.totalorder %s638_s17, 1  ;;  %p639_p5 = scmp.ge.s32.totalorder %s957_s15, 1 }
   0x9   : > { %p1018_p4 = por %p1213_p1, %p40_p0  ;;  %p119_p7 = scmp.lt.s32.totalorder %s957_s15, 3 }
   0xa   : > { %p1023_p6 = por %p112_p3, %p40_p0  ;;  %s959_s21 = smov [#allocation5]  }
   0xb   : > { %s1217_s18 = scalar_select %p1018_p4, 1, 0 }
   0xc   : > { %s1218_s19 = scalar_select %p1023_p6, 1, 0 }
   0xd   : > { %p1028_p8 = pnand %p639_p5, %p119_p7  ;;  %s131_s22 = sshll.u32 %s959_s21, 4  ;;  %s132_s22 = int_to_ptr.vmem [resolvable:$true] %s131_s22 }
   0xe   : > { %s1042_s24 = sadd.s32 1, %s957_s15   ;;  %s27_s25 = sadd.s32 1, %s953_s14 }
   0xf   : > { %s1219_s20 = scalar_select %p1028_p8, 1, 0 }
  0x10   : > { %p732_p9 = pneg %p1028_p8  ;;  %s24_s26 = ssub.s32 %s957_s15, %s1042_s24 }
  0x11   : > { %s846_s27 = scalar_lea.vmem %s132_s22, 4096  ;;  %p854_p5 = scmp.lt.s32.totalorder %s132_s22, %s132_s22 }
  0x12   : > { %p1037_p11 = pnand %p732_p9, %p1213_p1  ;;  %p847_p13 = scmp.ne.s32.totalorder %s132_s22, %s846_s27 }
  0x13   : > { %p855_p7 = scmp.lt.s32.totalorder %s846_s27, %s846_s27 }
  0x14   : > { %p837_p12 = pneg %p1037_p11 }
  0x15   : > { %p856_p10 = por %p855_p7, %p854_p5 }
  0x16   : > { %p849_p0 = pnand %p847_p13, %p837_p12 }
  0x18   : > { %p850_p3 = pneg %p849_p0 }
  0x1a   : > { %p857_p2 = pnand %p856_p10, %p850_p3 }
  0x1c   : > { %860 = shalt.err (!%p857_p2)
}
  0x1d   : > { %s960_s28 = smov 128   ;;  %s961_s29 = smov 8  }
  0x1e   : > { %735 = dma.hbm_to_vmem [thread:$0]  (!%p1037_p11), %s1210_s1, 4096, %s132_s22, [#allocation6], %s960_s28, %s960_s28, %s961_s29  }
  0x1f   : > { %p25_p9 = scmp.eq.s32.totalorder %s24_s26, 0  ;;  %p34_p12 = scmp.ne.s32.totalorder %s953_s14, %s949_s13 }
  0x20   : > { %p35_p10 = scmp.eq.s32.totalorder %s957_s15, 0  ;;  %p745_p2 = scmp.lt.s32.totalorder %s957_s15, 2 }
  0x21   : > { %s1059_s5 = scalar_select %p25_p9, %s953_s14, %s27_s25  }
  0x22   : > { %p36_p13 = por %p35_p10, %p34_p12  ;;  %p1221_p0 = scmp.eq.s32.totalorder %s1009_s16, 1 }
  0x23   : > { %s148_s7 = sand.u32 1, %s953_s14   ;;  %s689_s8 = sshll.u32 %s957_s15, 11 }
  0x24   : > { %p1063_p3 = por %p1221_p0, %p34_p12  ;;  %s642_s9 = sshll.u32 %s148_s7, 7 }
  0x25   : > { %s1072_s17 = scalar_lea.hbm %s1209_s0, %s689_s8  ;;  %s152_s21 = scalar_lea.vmem [#allocation2], %s642_s9 }
  0x26   : > { %s1222_s6 = scalar_select %p1063_p3, 1, 0 }
  0x27   : > { %s160_s22 = sshll.u32 %s152_s21, 4  ;;  %p1074_p11 = pnand %p745_p2, %p36_p13  ;;  %s1078_s22 = int_to_ptr.vmem [resolvable:$true] %s160_s22 }
  0x28   : > { %s1080_s25 = scalar_lea.sflag [#allocation3], %s148_s7  ;;  %s861_s26 = scalar_lea.hbm %s1072_s17, 2048 }
  0x29   : > { %p862_p5 = scmp.ne.s32.totalorder %s1072_s17, %s861_s26  ;;  %p863_p7 = pneg %p1074_p11 }
  0x2a   : > { %s866_s29 = scalar_lea.hbm %s1209_s0, 4096  ;;  %p867_p10 = scmp.lt.s32.totalorder %s1072_s17, %s1209_s0 }
  0x2b   : > { %p864_p9 = pnand %p863_p7, %p862_p5  ;;  %p868_p2 = scmp.lt.s32.totalorder %s866_s29, %s861_s26 }
  0x2d   : > { %p865_p12 = pneg %p864_p9  ;;  %p869_p13 = por %p868_p2, %p867_p10 }
  0x2f   : > { %p870_p0 = pnand %p869_p13, %p865_p12 }
  0x31   : > { %873 = shalt.err (!%p870_p0)
}
  0x32   : > { %s874_s7 = scalar_lea.vmem %s1078_s22, 2048  ;;  %s962_s8 = smov [#allocation2]  }
  0x33   : > { %p875_p1 = scmp.ne.s32.totalorder %s1078_s22, %s874_s7  ;;  %s879_s9 = sshll.u32 %s962_s8, 4  ;;  %s880_s9 = int_to_ptr.vmem [resolvable:$false] %s879_s9 }
  0x34   : > { %s881_s10 = scalar_lea.vmem %s880_s9, 4096  ;;  %p882_p9 = scmp.lt.s32.totalorder %s1078_s22, %s880_s9 }
  0x35   : > { %p877_p6 = pnand %p875_p1, %p863_p7  ;;  %p883_p3 = scmp.lt.s32.totalorder %s881_s10, %s874_s7 }
  0x37   : > { %p878_p5 = pneg %p877_p6  ;;  %p884_p4 = por %p883_p3, %p882_p9 }
  0x39   : > { %p885_p8 = pnand %p884_p4, %p878_p5 }
  0x3b   : > { %888 = shalt.err (!%p885_p8)
}
  0x3c   : > { %s963_s11 = smov 256   ;;  %s964_s21 = smov 16  }
  0x3d   : > { %739 = dma.hbm_to_vmem [thread:$0]  (!%p1074_p11), %s1072_s17, 2048, %s1078_s22, %s1080_s25, %s963_s11, %s963_s11, %s964_s21  }
  0x3e   : > { %p1224_p1 = scmp.ne.s32.totalorder %s1219_s20, 0 }
  0x3f   : > { %s1104_s26 = sand.u32 (!%p1224_p1), 1, %s949_s13   ;;  %p1225_p4 = scmp.ne.s32.totalorder (!%p1224_p1), %s1217_s18, 0 }
  0x40   : > { %172 = sbr.rel (%p1224_p1) target bundleno = 363 (0x16b), region = 32  ;;  %s647_s27 = sshll.u32 (!%p1224_p1), %s1104_s26, 7 }
  0x41   : > { %s175_s28 = scalar_lea.sflag (!%p1224_p1), [#allocation3], %s1104_s26  ;;  %s1110_s29 = scalar_lea.vmem (!%p1224_p1), [#allocation2], %s647_s27 }
  0x45   : > { %932 = dma.done.wait (%p1225_p4), %s175_s28, 2048  }
  0x46   : > { %934 = vsyncadd (%p1225_p4), %s175_s28, 4294965248  ;;  %p1226_p6 = scmp.eq.s32.totalorder %s1009_s16, 0 }
  0x48   : > { %936 = dma.done.wait (%p1226_p6), [#allocation6], 4096   ;;  %p1227_p8 = pmov %p1226_p6 }
  0x49   : > { %v787_v0 = vld [vmem:[#allocation5 + $0x74] ss:$8 sps:$4 sm:$0xff]   ;;  %v789_v1 = vld [vmem:[#allocation5 + $0x70] ss:$8 sps:$4 sm:$0xff]   ;;  %v790_v2 = vld [vmem:[#allocation5 + $0x64] ss:$8 sps:$4 sm:$0xff]   ;;  %v265_v56 = vlaneseq }
  0x4a   : > { %938 = vsyncadd (%p1227_p8), [#allocation6], 4294963200  ;;  %435 = vmatprep.subr.bf16.mxu0 %v787_v0  ;;  %692 = vmatprep.subr.bf16.mxu1 %v787_v0  ;;  %v792_v3 = vld [vmem:[#allocation5 + $0x60] ss:$8 sps:$4 sm:$0xff]   ;;  %v793_v4 = vld [vmem:[#allocation5 + $0x54] ss:$8 sps:$4 sm:$0xff]  }
  0x4b   : > { %436 = vmatpush1.bf16.msra.mxu0 %v789_v1  ;;  %708 = vmatpush1.bf16.msra.mxu1 %v789_v1  ;;  %v795_v5 = vld [vmem:[#allocation5 + $0x50] ss:$8 sps:$4 sm:$0xff]   ;;  %v796_v6 = vld [vmem:[#allocation5 + $0x44] ss:$8 sps:$4 sm:$0xff]   ;;  %v798_v7 = vld [vmem:[#allocation5 + $0x40] ss:$8 sps:$4 sm:$0xff]  }
  0x4c   : > { %437 = vmatprep.subr.bf16.mxu0 %v790_v2  ;;  %693 = vmatprep.subr.bf16.mxu1 %v790_v2  ;;  %v799_v8 = vld [vmem:[#allocation5 + $0x34] ss:$8 sps:$4 sm:$0xff]   ;;  %v801_v9 = vld [vmem:[#allocation5 + $0x30] ss:$8 sps:$4 sm:$0xff]   ;;  %v802_v10 = vld [vmem:[#allocation5 + $0x24] ss:$8 sps:$4 sm:$0xff]  }
  0x4d   : > { %v804_v11 = vld [vmem:[#allocation5 + $0x20] ss:$8 sps:$4 sm:$0xff]   ;;  %v805_v12 = vld [vmem:[#allocation5 + $0x14] ss:$8 sps:$4 sm:$0xff]   ;;  %v807_v18 = vld [vmem:[#allocation5 + $0x10] ss:$8 sps:$4 sm:$0xff]  }
  0x4e   : > { %v208_v13 = vld [vmem:[%s1110_s29 + $0x8] sm:$0xff]  ;;  %v210_v14 = vld [vmem:[%s1110_s29 + $0x18] sm:$0xff]  ;;  %v207_v38 = vld [vmem:[%s1110_s29] sm:$0xff]  ;;  %v266_v57 = vshrl.u32 %v265_v56, 7  ;;  %s1141_s17 = scalar_lea.vmem [#allocation7], %s647_s27  ;;  %s691_s22 = sshll.u32 %s1009_s16, 11 }
  0x4f   : > { %438 = vmatpush1.bf16.msra.mxu0 %v792_v3  ;;  %709 = vmatpush1.bf16.msra.mxu1 %v792_v3  ;;  %v224_v15 = vpack.c.bf16 %v210_v14, %v208_v13  ;;  %v216_v16 = vld [vmem:[%s1110_s29 + $0x48] sm:$0xff]  ;;  %v218_v17 = vld [vmem:[%s1110_s29 + $0x58] sm:$0xff]  ;;  %v209_v39 = vld [vmem:[%s1110_s29 + $0x10] sm:$0xff]  ;;  %s555_s23 = sshll.u32 %s1141_s17, 4  ;;  %s1160_s4 = scalar_lea.hbm %s1212_s3, %s691_s22  ;;  %s1162_s23 = int_to_ptr.vmem [resolvable:$true] %s555_s23 }
  0x50   : > { %439 = vmatprep.subr.bf16.mxu0 %v793_v4  ;;  %694 = vmatprep.subr.bf16.mxu1 %v793_v4  ;;  %v228_v19 = vpack.c.bf16 %v218_v17, %v216_v16  ;;  %v808_v20 = vld [vmem:[#allocation5 + $0x4] ss:$8 sps:$4 sm:$0xff]   ;;  %v810_v21 = vld [vmem:[#allocation5] ss:$8 sps:$4 sm:$0xff]   ;;  %v811_v22 = vld [vmem:[#allocation5 + $0xf4] ss:$8 sps:$4 sm:$0xff]   ;;  %v223_v46 = vpack.c.bf16 %v209_v39, %v207_v38 }
  0x51   : > { %467 = vmatprep.mubr.bf16.mxu0 %v224_v15  ;;  %v813_v23 = vld [vmem:[#allocation5 + $0xf0] ss:$8 sps:$4 sm:$0xff]   ;;  %v814_v24 = vld [vmem:[#allocation5 + $0xe4] ss:$8 sps:$4 sm:$0xff]   ;;  %v816_v25 = vld [vmem:[#allocation5 + $0xe0] ss:$8 sps:$4 sm:$0xff]  }
  0x52   : > { %487 = vmatprep.mubr.bf16.mxu1 %v228_v19  ;;  %v817_v26 = vld [vmem:[#allocation5 + $0xd4] ss:$8 sps:$4 sm:$0xff]   ;;  %v819_v27 = vld [vmem:[#allocation5 + $0xd0] ss:$8 sps:$4 sm:$0xff]   ;;  %v820_v28 = vld [vmem:[#allocation5 + $0xc4] ss:$8 sps:$4 sm:$0xff]  }
  0x53   : > { %440 = vmatpush1.bf16.msra.mxu0 %v795_v5  ;;  %710 = vmatpush1.bf16.msra.mxu1 %v795_v5  ;;  %v822_v29 = vld [vmem:[#allocation5 + $0xc0] ss:$8 sps:$4 sm:$0xff]   ;;  %v823_v30 = vld [vmem:[#allocation5 + $0xb4] ss:$8 sps:$4 sm:$0xff]   ;;  %v825_v31 = vld [vmem:[#allocation5 + $0xb0] ss:$8 sps:$4 sm:$0xff]  }
  0x54   : > { %441 = vmatprep.subr.bf16.mxu0 %v796_v6  ;;  %695 = vmatprep.subr.bf16.mxu1 %v796_v6  ;;  %v826_v32 = vld [vmem:[#allocation5 + $0xa4] ss:$8 sps:$4 sm:$0xff]   ;;  %v828_v33 = vld [vmem:[#allocation5 + $0xa0] ss:$8 sps:$4 sm:$0xff]   ;;  %v829_v34 = vld [vmem:[#allocation5 + $0x94] ss:$8 sps:$4 sm:$0xff]  }
  0x55   : > { %v831_v35 = vld [vmem:[#allocation5 + $0x90] ss:$8 sps:$4 sm:$0xff]   ;;  %v832_v36 = vld [vmem:[#allocation5 + $0x84] ss:$8 sps:$4 sm:$0xff]   ;;  %v834_v37 = vld [vmem:[#allocation5 + $0x80] ss:$8 sps:$4 sm:$0xff]  }
  0x56   : > { %v215_v40 = vld [vmem:[%s1110_s29 + $0x40] sm:$0xff]  ;;  %v217_v41 = vld [vmem:[%s1110_s29 + $0x50] sm:$0xff]  ;;  %v212_v42 = vld [vmem:[%s1110_s29 + $0x28] sm:$0xff]  ;;  %v267_v58 = vsub.s32 0, %v266_v57  ;;  %v271_v60 = vsub.s32 1, %v266_v57  ;;  %s541_s16 = scalar_lea.sflag [#allocation4], %s1104_s26 }
  0x57   : > { %442 = vmatpush1.bf16.msra.mxu0 %v798_v7  ;;  %711 = vmatpush1.bf16.msra.mxu1 %v798_v7  ;;  %v214_v43 = vld [vmem:[%s1110_s29 + $0x38] sm:$0xff]  ;;  %v220_v44 = vld [vmem:[%s1110_s29 + $0x68] sm:$0xff]  ;;  %v227_v47 = vpack.c.bf16 %v217_v41, %v215_v40  ;;  %v211_v50 = vld [vmem:[%s1110_s29 + $0x20] sm:$0xff]  ;;  %s889_s7 = scalar_lea.vmem %s1162_s23, 2048  ;;  %p1228_p11 = scmp.ne.s32.totalorder %s1222_s6, 0 }
  0x58   : > { %443 = vmatprep.subr.bf16.mxu0 %v799_v8  ;;  %696 = vmatprep.subr.bf16.mxu1 %v799_v8  ;;  %v222_v45 = vld [vmem:[%s1110_s29 + $0x78] sm:$0xff]  ;;  %v226_v48 = vpack.c.bf16 %v214_v43, %v212_v42  ;;  %v213_v51 = vld [vmem:[%s1110_s29 + $0x30] sm:$0xff]  ;;  %v219_v52 = vld [vmem:[%s1110_s29 + $0x60] sm:$0xff]  ;;  %p890_p3 = scmp.ne.s32.totalorder %s1162_s23, %s889_s7  ;;  %s965_s8 = smov [#allocation7]  }
  0x59   : > { %v230_v49 = vpack.c.bf16 %v222_v45, %v220_v44  ;;  %v221_v53 = vld [vmem:[%s1110_s29 + $0x70] sm:$0xff]  ;;  %v225_v54 = vpack.c.bf16 %v213_v51, %v211_v50  ;;  %v263_v59 = vld [vmem:[%s1211_s2] sm:$0x3]  ;;  %s893_s9 = sshll.u32 %s965_s8, 4  ;;  %s894_s9 = int_to_ptr.vmem [resolvable:$false] %s893_s9 }
  0x5a   : > { %v229_v55 = vpack.c.bf16 %v221_v53, %v219_v52  ;;  %v268_v61 = vrot.slane %v263_v59, %v267_v58  ;;  %v272_v62 = vrot.slane %v263_v59, %v271_v60  ;;  %p891_p7 = pnand %p890_p3, %p1228_p11  ;;  %s895_s10 = scalar_lea.vmem %s894_s9, 4096 }
  0x5b   : > { %444 = vmatpush1.bf16.msra.mxu0 %v801_v9  ;;  %712 = vmatpush1.bf16.msra.mxu1 %v801_v9  ;;  %p896_p10 = scmp.lt.s32.totalorder %s1162_s23, %s894_s9  ;;  %p897_p2 = scmp.lt.s32.totalorder %s895_s10, %s889_s7 }
  0x5c   : > { %445 = vmatprep.subr.bf16.mxu0 %v802_v10  ;;  %697 = vmatprep.subr.bf16.mxu1 %v802_v10  ;;  %p892_p12 = pneg %p891_p7 }
  0x5d   : > { %p898_p13 = por %p897_p2, %p896_p10 }
  0x5f   : > { %446 = vmatpush1.bf16.msra.mxu0 %v804_v11  ;;  %713 = vmatpush1.bf16.msra.mxu1 %v804_v11  ;;  %p899_p0 = pnand %p898_p13, %p892_p12 }
  0x60   : > { %447 = vmatprep.subr.bf16.mxu0 %v805_v12  ;;  %698 = vmatprep.subr.bf16.mxu1 %v805_v12 }
  0x63   : > { %448 = vmatpush1.bf16.msra.mxu0 %v807_v18  ;;  %714 = vmatpush1.bf16.msra.mxu1 %v807_v18 }
  0x64   : > { %449 = vmatprep.subr.bf16.mxu0 %v808_v20  ;;  %699 = vmatprep.subr.bf16.mxu1 %v808_v20 }
  0x67   : > { %450 = vmatpush1.bf16.msra.mxu0 %v810_v21  ;;  %715 = vmatpush1.bf16.msra.mxu1 %v810_v21 }
  0x68   : > { %451 = vmatprep.subr.bf16.mxu0 %v811_v22  ;;  %700 = vmatprep.subr.bf16.mxu1 %v811_v22 }
  0x6b   : > { %452 = vmatpush2.bf16.msra.mxu0 %v813_v23  ;;  %716 = vmatpush2.bf16.msra.mxu1 %v813_v23 }
  0x6c   : > { %453 = vmatprep.subr.bf16.mxu0 %v814_v24  ;;  %701 = vmatprep.subr.bf16.mxu1 %v814_v24 }
  0x6f   : > { %454 = vmatpush2.bf16.msra.mxu0 %v816_v25  ;;  %717 = vmatpush2.bf16.msra.mxu1 %v816_v25 }
  0x70   : > { %455 = vmatprep.subr.bf16.mxu0 %v817_v26  ;;  %702 = vmatprep.subr.bf16.mxu1 %v817_v26 }
  0x73   : > { %456 = vmatpush2.bf16.msra.mxu0 %v819_v27  ;;  %718 = vmatpush2.bf16.msra.mxu1 %v819_v27 }
  0x74   : > { %457 = vmatprep.subr.bf16.mxu0 %v820_v28  ;;  %703 = vmatprep.subr.bf16.mxu1 %v820_v28 }
  0x77   : > { %458 = vmatpush2.bf16.msra.mxu0 %v822_v29  ;;  %719 = vmatpush2.bf16.msra.mxu1 %v822_v29 }
  0x78   : > { %459 = vmatprep.subr.bf16.mxu0 %v823_v30  ;;  %704 = vmatprep.subr.bf16.mxu1 %v823_v30 }
  0x7b   : > { %460 = vmatpush2.bf16.msra.mxu0 %v825_v31  ;;  %720 = vmatpush2.bf16.msra.mxu1 %v825_v31 }
  0x7c   : > { %461 = vmatprep.subr.bf16.mxu0 %v826_v32  ;;  %705 = vmatprep.subr.bf16.mxu1 %v826_v32 }
  0x7f   : > { %462 = vmatpush2.bf16.msra.mxu0 %v828_v33  ;;  %721 = vmatpush2.bf16.msra.mxu1 %v828_v33 }
  0x80   : > { %463 = vmatprep.subr.bf16.mxu0 %v829_v34  ;;  %706 = vmatprep.subr.bf16.mxu1 %v829_v34 }
  0x83   : > { %464 = vmatpush2.bf16.msra.mxu0 %v831_v35  ;;  %722 = vmatpush2.bf16.msra.mxu1 %v831_v35 }
  0x84   : > { %465 = vmatprep.subr.bf16.mxu0 %v832_v36  ;;  %707 = vmatprep.subr.bf16.mxu1 %v832_v36 }
  0x87   : > { %466 = vmatpush2.bf16.msra.mxu0 %v834_v37  ;;  %723 = vmatpush2.bf16.msra.mxu1 %v834_v37 }
  0x8a   : > { %468 = vmatmul.mubr.bf16.vlgmr.msra.gmra.mxu0 %v223_v46  ;;  %488 = vmatmul.mubr.bf16.vlgmr.msra.gmra.mxu1 %v227_v47 }
  0x8b   : > { %477 = vmatprep.mubr.bf16.mxu0 %v226_v48  ;;  %497 = vmatprep.mubr.bf16.mxu1 %v230_v49 }
  0x92   : > { %478 = vmatmul.mubr.bf16.gmra.mxu0 %v225_v54  ;;  %498 = vmatmul.mubr.bf16.gmra.mxu1 %v229_v55 }
 0x14a   : > { %v469_v63 = vpop.f32.mrf.mxu0  ;;  %v489_v0 = vpop.f32.mrf.mxu1 }
 0x14b   : > { %v470_v1 = vadd.f32 %v469_v63, %v268_v61  ;;  %v490_v2 = vadd.f32 %v489_v0, %v268_v61 }
 0x14c   : > { %v471_v3 = vpop.f32.mrf.mxu0  ;;  %v491_v4 = vpop.f32.mrf.mxu1 }
 0x14d   : > { %v508_v5 = vmax.f32 %v470_v1, 0.0  ;;  %v516_v6 = vmax.f32 %v490_v2, 0.0  ;;  %v472_v7 = vadd.f32 %v471_v3, %v272_v62  ;;  %v492_v8 = vadd.f32 %v491_v4, %v272_v62 }
 0x14e   : > { %v473_v9 = vpop.f32.mrf.mxu0  ;;  %v493_v10 = vpop.f32.mrf.mxu1 }
 0x14f   : > { %524 = vst [vmem:[%s1141_s17] sm:$0xff] %v508_v5  ;;  %532 = vst [vmem:[%s1141_s17 + $0x40] sm:$0xff] %v516_v6  ;;  %v509_v11 = vmax.f32 %v472_v7, 0.0  ;;  %v517_v12 = vmax.f32 %v492_v8, 0.0  ;;  %v474_v13 = vadd.f32 %v473_v9, %v268_v61  ;;  %v494_v14 = vadd.f32 %v493_v10, %v268_v61 }
 0x150   : > { %v475_v15 = vpop.f32.mrf.mxu0  ;;  %v495_v16 = vpop.f32.mrf.mxu1 }
 0x151   : > { %525 = vst [vmem:[%s1141_s17 + $0x8] sm:$0xff] %v509_v11  ;;  %533 = vst [vmem:[%s1141_s17 + $0x48] sm:$0xff] %v517_v12  ;;  %v510_v17 = vmax.f32 %v474_v13, 0.0  ;;  %v518_v18 = vmax.f32 %v494_v14, 0.0  ;;  %v476_v19 = vadd.f32 %v475_v15, %v272_v62  ;;  %v496_v20 = vadd.f32 %v495_v16, %v272_v62 }
 0x152   : > { %v479_v21 = vpop.f32.mrf.mxu0  ;;  %v499_v22 = vpop.f32.mrf.mxu1 }
 0x153   : > { %526 = vst [vmem:[%s1141_s17 + $0x10] sm:$0xff] %v510_v17  ;;  %534 = vst [vmem:[%s1141_s17 + $0x50] sm:$0xff] %v518_v18  ;;  %v511_v23 = vmax.f32 %v476_v19, 0.0  ;;  %v519_v24 = vmax.f32 %v496_v20, 0.0  ;;  %v480_v25 = vadd.f32 %v479_v21, %v268_v61  ;;  %v500_v26 = vadd.f32 %v499_v22, %v268_v61 }
 0x154   : > { %v481_v27 = vpop.f32.mrf.mxu0  ;;  %v501_v28 = vpop.f32.mrf.mxu1 }
 0x155   : > { %527 = vst [vmem:[%s1141_s17 + $0x18] sm:$0xff] %v511_v23  ;;  %535 = vst [vmem:[%s1141_s17 + $0x58] sm:$0xff] %v519_v24  ;;  %v512_v29 = vmax.f32 %v480_v25, 0.0  ;;  %v520_v30 = vmax.f32 %v500_v26, 0.0  ;;  %v482_v31 = vadd.f32 %v481_v27, %v272_v62  ;;  %v502_v32 = vadd.f32 %v501_v28, %v272_v62 }
 0x156   : > { %v483_v33 = vpop.f32.mrf.mxu0  ;;  %v503_v34 = vpop.f32.mrf.mxu1 }
 0x157   : > { %528 = vst [vmem:[%s1141_s17 + $0x20] sm:$0xff] %v512_v29  ;;  %536 = vst [vmem:[%s1141_s17 + $0x60] sm:$0xff] %v520_v30  ;;  %v513_v35 = vmax.f32 %v482_v31, 0.0  ;;  %v521_v36 = vmax.f32 %v502_v32, 0.0  ;;  %v484_v37 = vadd.f32 %v483_v33, %v268_v61  ;;  %v504_v38 = vadd.f32 %v503_v34, %v268_v61 }
 0x158   : > { %v485_v39 = vpop.f32.mrf.mxu0  ;;  %v505_v40 = vpop.f32.mrf.mxu1 }
 0x159   : > { %529 = vst [vmem:[%s1141_s17 + $0x28] sm:$0xff] %v513_v35  ;;  %537 = vst [vmem:[%s1141_s17 + $0x68] sm:$0xff] %v521_v36  ;;  %v514_v41 = vmax.f32 %v484_v37, 0.0  ;;  %v522_v42 = vmax.f32 %v504_v38, 0.0  ;;  %v486_v43 = vadd.f32 %v485_v39, %v272_v62  ;;  %v506_v44 = vadd.f32 %v505_v40, %v272_v62 }
 0x15b   : > { %530 = vst [vmem:[%s1141_s17 + $0x30] sm:$0xff] %v514_v41  ;;  %538 = vst [vmem:[%s1141_s17 + $0x70] sm:$0xff] %v522_v42  ;;  %v515_v45 = vmax.f32 %v486_v43, 0.0  ;;  %v523_v46 = vmax.f32 %v506_v44, 0.0 }
 0x15d   : > { %531 = vst [vmem:[%s1141_s17 + $0x38] sm:$0xff] %v515_v45  ;;  %539 = vst [vmem:[%s1141_s17 + $0x78] sm:$0xff] %v523_v46 }
 0x15e   : > { %902 = shalt.err (!%p899_p0)
}
 0x15f   : > { %s903_s11 = scalar_lea.hbm %s1160_s4, 2048  ;;  %s907_s28 = scalar_lea.hbm %s1212_s3, 4096 }
 0x160   : > { %p904_p5 = scmp.ne.s32.totalorder %s1160_s4, %s903_s11  ;;  %p908_p4 = scmp.lt.s32.totalorder %s1160_s4, %s1212_s3 }
 0x161   : > { %p909_p6 = scmp.lt.s32.totalorder %s907_s28, %s903_s11 }
 0x162   : > { %p905_p9 = pnand %p904_p5, %p1228_p11 }
 0x163   : > { %p910_p8 = por %p909_p6, %p908_p4 }
 0x164   : > { %p906_p1 = pneg %p905_p9 }
 0x166   : > { %p911_p3 = pnand %p910_p8, %p906_p1 }
 0x168   : > { %914 = shalt.err (!%p911_p3)
}
 0x169   : > { %s966_s20 = smov 256   ;;  %s967_s17 = smov 16  }
 0x16a   : > { %730 = dma.vmem_to_hbm [thread:$0]  (%p1228_p11), %s1162_s23, 2048, %s1160_s4, %s541_s16, %s966_s20, %s966_s20, %s967_s17  }
 0x16b PF: > { %s570_s22 = sand.u32 1, %s945_s12   ;;  %p1229_p7 = scmp.ne.s32.totalorder %s1218_s19, 0 }
 0x16c   : > { %p1230_p12 = scmp.ge.s32.totalorder %s957_s15, 2  ;;  %s571_s25 = scalar_lea.sflag [#allocation4], %s570_s22 }
 0x16e   : > { %p741_p10 = pnand %p1230_p12, %p1229_p7 }
 0x170   : > { %p742_p2 = pneg %p741_p10 }
 0x172   : > { %940 = dma.done.wait (%p742_p2), %s571_s25, 2048  }
 0x173   : > { %942 = vsyncadd (%p742_p2), %s571_s25, 4294965248  ;;  %p17_p13 = scmp.ge.s32.totalorder %s1042_s24, 4   ;;  %s1231_s12 = smov %s949_s13 }
 0x174   : > { %s1232_s13 = smov %s953_s14  ;;  %s1233_s14 = smov %s1059_s5 }
 0x175   : > { %s1234_s15 = smov %s1042_s24  ;;  %19 = sbr.rel (!%p17_p13) target bundleno = 6 (0x6), region = 81 }
 0x17a   :  { %576 = vsyncpa [#allocation3], 1 }
 0x17b   :  { %578 = vsyncpa [#allocation3 + $0x1], 1 }
 0x17c   :  { %579 = vsyncpa [#allocation6], 1 }
 0x17d   :  { %580 = vsyncpa [#allocation4], 1 }
 0x17e   :  { %582 = vsyncpa [#allocation4 + $0x1], 1 }

</bundles_post_ra>
